<compile_context>
chip_gen: v5e
topology: v5e:2x2
jax: 0.10.0
libtpu: 0.0.40
codegen_flags: <defaults>
</compile_context>

<pallas_src>
import jax
import jax.numpy as jnp
import numpy as np
from jax import lax
from jax.experimental import pallas as pl
from jax.experimental.pallas import tpu as pltpu


# --------------------------- in-kernel math helpers --------------------------- #

def _erf_approx(x):
    """Abramowitz & Stegun 7.1.26 rational erf approximation, |err| <= 1.5e-7."""
    a1, a2, a3, a4, a5 = 0.254829592, -0.284496736, 1.421413741, -1.453152027, 1.061405429
    p = 0.3275911
    sgn = jnp.where(x < 0.0, -1.0, 1.0)
    ax = jnp.abs(x)
    t = 1.0 / (1.0 + p * ax)
    poly = ((((a5 * t + a4) * t + a3) * t + a2) * t + a1) * t
    return sgn * (1.0 - poly * jnp.exp(-ax * ax))


def _gelu_exact(x):
    """Exact (erf-based) GELU, matching torch.nn.GELU() default."""
    return 0.5 * x * (1.0 + _erf_approx(x * 0.7071067811865476))


# ------------------------------- fused kernel -------------------------------- #

def _fused_kernel(xv_ref, khw_ref, bhw_ref, kdt_ref, bd_ref,
                  w1_ref, b1_ref, w2t_ref, b2t_ref, kpt_ref, bp_ref, o_ref):
    f32 = jnp.float32
    bblk, WH, DC = xv_ref.shape
    DO = o_ref.shape[-1]

    xv = xv_ref[...]                                   # (Bblk, WH, DC)  bf16
    xv2 = xv.reshape(bblk * WH, DC)                    # lane-dense 2-D slab

    # --- H-mix + W-mix fused: one batched weights-left matmul (Khw = [Kh; Kw]) ---
    khw_b = jnp.broadcast_to(khw_ref[...], (bblk, 2 * WH, WH))
    hw = lax.dot_general(khw_b, xv,
                         dimension_numbers=(((2,), (1,)), ((0,), (0,))),
                         preferred_element_type=f32)   # (Bblk, 2*WH, DC) f32
    hw = hw + bhw_ref[...]                             # bias pre-broadcast to (2*WH, DC)
    h = hw[:, :WH, :]                                  # (Bblk, WH, DC)
    w = hw[:, WH:, :]

    # --- D-mix (weights-right, batch folded into M) ---
    d = (jnp.dot(xv2, kdt_ref[...], preferred_element_type=f32)
         + bd_ref[...]).reshape(bblk, WH, DC)

    # --- per-sample spatial mean (1/P folded into w1_ref) + reweight MLP (all f32) ---
    colsum = jnp.sum(h + w + d, axis=1)                # (Bblk, DC)
    z = jnp.dot(colsum, w1_ref[...], preferred_element_type=f32) + b1_ref[...]
    z = _gelu_exact(z)                                 # (Bblk, hid)

    # merged fc2: one matmul, outputs pre-tiled along D -> three aligned 128-lane slices
    r = jnp.dot(z, w2t_ref[...], preferred_element_type=f32) + b2t_ref[...]  # (Bblk, 3*DC)
    r0 = r[:, :DC]
    r1 = r[:, DC:2 * DC]
    r2 = r[:, 2 * DC:]

    # 3-way softmax; reciprocal on the EUP slot
    m = jnp.maximum(jnp.maximum(r0, r1), r2)
    e0 = jnp.exp(r0 - m)
    e1 = jnp.exp(r1 - m)
    e2 = jnp.exp(r2 - m)
    inv = pl.reciprocal(e0 + e1 + e2, approx=True)
    g0 = (e0 * inv)[:, None, :]                        # (Bblk, 1, DC) gates
    g1 = (e1 * inv)[:, None, :]
    g2 = (e2 * inv)[:, None, :]

    # --- weighted combine + output projection ---
    comb = h * g0 + w * g1 + d * g2                    # (Bblk, WH, DC) f32
    comb2 = comb.reshape(bblk * WH, DC).astype(xv.dtype)   # bf16 into the MXU
    out = jnp.dot(comb2, kpt_ref[...], preferred_element_type=f32) + bp_ref[...]
    o_ref[...] = out.reshape(bblk, WH, DO)


# ------------------------------ module wrapper -------------------------------- #

def weighted_permute_mlp_3d(x, params, bblk=None):
    B, S1, S2, S3, C = x.shape
    S = params["hwd"]
    assert S1 == S2 == S3 == S and C % S == 0
    f32, bf16 = jnp.float32, jnp.bfloat16

    Wh, bh = params["Wh"], params["bh"]
    Ww, bw = params["Ww"], params["bw"]
    Wd, bd = params["Wd"], params["bd"]
    W1, b1 = params["W1"], params["b1"]
    W2, b2 = params["W2"], params["b2"]
    Wp, bp = params["Wp"], params["bp"]
    out_dim = Wp.shape[0]
    hid = W1.shape[0]

    W = H = D = S
    WH, DC, DO = W * H, D * C, D * out_dim
    P = W * H * D

    # Batch-block size: amortize per-step pipeline overhead while keeping >=2 grid steps
    # (keeps both v7x TensorCores busy via the "parallel" grid axis).
    if bblk is None:
        bblk = 1
        for cand in (8, 4, 2):
            if B % cand == 0 and B // cand >= 2:
                bblk = cand
                break
    assert B % bblk == 0
    nsteps = B // bblk

    # ---- one-time weight restructuring (plain JAX; no HBM activation traffic) ----
    eyeC = jnp.eye(C, dtype=f32)
    eyeH = jnp.eye(H, dtype=f32)
    eyeW = jnp.eye(W, dtype=f32)
    eyeD = jnp.eye(D, dtype=f32)

    Kh = jnp.kron(eyeW, Wh)                       # (WH, WH)   H-mix, weights-left
    Kw = jnp.kron(Ww, eyeH)                       # (WH, WH)   W-mix, weights-left
    Khw = jnp.concatenate([Kh, Kw], axis=0).astype(bf16)      # (2*WH, WH) fused H/W mix
    KdT = jnp.kron(Wd.T, eyeC).astype(bf16)       # (DC, DC)   D-mix, weights-right
    KpT = jnp.kron(eyeD, Wp.T).astype(bf16)       # (DC, DO)   output projection

    bh_rows = jnp.tile(bh, W)                     # bias over rows (w, h')
    bw_rows = jnp.repeat(bw, H)                   # bias over rows (w', h)
    bhw = jnp.broadcast_to(jnp.concatenate([bh_rows, bw_rows])[:, None],
                           (2 * WH, DC)).astype(f32)          # pre-broadcast (no lane bcast)
    bd_row = jnp.repeat(bd, C).reshape(1, DC)     # bias over cols (d', c)
    bp_row = jnp.tile(bp, D).reshape(1, DO)       # proj bias over cols (d, co)

    # spatial mean folded into fc1:  a_mean @ W1.T  ==  colsum @ W1eff
    Tmat = jnp.tile(eyeC, (D, 1))                 # (DC, C)
    W1eff = (Tmat @ W1.T) * (1.0 / P)             # (DC, hid) f32
    b1_row = b1.reshape(1, hid)

    # fc2 merged into one (hid, 3*DC) matrix, branch outputs pre-tiled along D
    W2_3 = W2.reshape(C, 3, hid)                  # [c, j, k] = W2[3c+j, k]
    b2_3 = b2.reshape(C, 3)
    W2t = jnp.concatenate([jnp.tile(W2_3[:, j, :].T, (1, D)) for j in range(3)],
                          axis=1)                 # (hid, 3*DC) f32
    b2t = jnp.concatenate([jnp.tile(b2_3[:, j], D) for j in range(3)]).reshape(1, 3 * DC)

    # lane-dense bf16 activation view (pure reshape + cast; halves activation DMA bytes)
    xv = x.reshape(B, WH, DC).astype(bf16)

    # advisory cost estimate for the XLA scheduler
    flops = int(B * 2 * (2 * WH * WH * DC + WH * DC * DC + DC * hid
                         + hid * 3 * DC + WH * DC * DO))
    transc = int(B * (4 * DC + 2 * hid))
    bytes_acc = int(B * WH * DC * 2 + B * WH * DO * 4
                    + 2 * WH * WH * 2 + 2 * WH * DC * 4 + DC * DC * 2 + DC * 4
                    + DC * hid * 4 + hid * 4 + hid * 3 * DC * 4 + 3 * DC * 4
                    + DC * DO * 2 + DO * 4)

    out_flat = pl.pallas_call(
        _fused_kernel,
        out_shape=jax.ShapeDtypeStruct((B, WH, DO), f32),
        grid=(nsteps,),
        in_specs=[
            pl.BlockSpec((bblk, WH, DC), lambda i: (i, 0, 0)),    # xv (batch block)
            pl.BlockSpec((2 * WH, WH), lambda i: (0, 0)),         # Khw
            pl.BlockSpec((2 * WH, DC), lambda i: (0, 0)),         # bhw (pre-broadcast)
            pl.BlockSpec((DC, DC), lambda i: (0, 0)),             # KdT
            pl.BlockSpec((1, DC), lambda i: (0, 0)),              # bd_row
            pl.BlockSpec((DC, hid), lambda i: (0, 0)),            # W1eff
            pl.BlockSpec((1, hid), lambda i: (0, 0)),             # b1_row
            pl.BlockSpec((hid, 3 * DC), lambda i: (0, 0)),        # W2t (merged fc2)
            pl.BlockSpec((1, 3 * DC), lambda i: (0, 0)),          # b2t
            pl.BlockSpec((DC, DO), lambda i: (0, 0)),             # KpT
            pl.BlockSpec((1, DO), lambda i: (0, 0)),              # bp_row
        ],
        out_specs=pl.BlockSpec((bblk, WH, DO), lambda i: (i, 0, 0)),
        compiler_params=pltpu.CompilerParams(dimension_semantics=("parallel",)),
        cost_estimate=pl.CostEstimate(flops=flops, transcendentals=transc,
                                      bytes_accessed=bytes_acc),
    )(xv, Khw, bhw, KdT, bd_row, W1eff, b1_row, W2t, b2t, KpT, bp_row)

    # proj_drop / Mlp.drop are identity (p = 0.0 / eval semantics)
    return out_flat.reshape(B, S, S, S, out_dim)


# ------------------------------ pure-JAX reference ---------------------------- #

def reference(x, params):
    Wh, bh = params["Wh"], params["bh"]
    Ww, bw = params["Ww"], params["bw"]
    Wd, bd = params["Wd"], params["bd"]
    W1, b1 = params["W1"], params["b1"]
    W2, b2 = params["W2"], params["b2"]
    Wp, bp = params["Wp"], params["bp"]
    B = x.shape[0]

    h = jnp.einsum("bwhdc,ph->bwpdc", x, Wh) + bh[None, None, :, None, None]
    w = jnp.einsum("bwhdc,pw->bphdc", x, Ww) + bw[None, :, None, None, None]
    d = jnp.einsum("bwhdc,pd->bwhpc", x, Wd) + bd[None, None, None, :, None]
    a = (h + w + d).mean(axis=(1, 2, 3))                          # (B, C)
    z = jax.nn.gelu(a @ W1.T + b1, approximate=False)
    r = (z @ W2.T + b2).reshape(B, -1, 3).transpose(2, 0, 1)      # (3, B, C)
    r = jax.nn.softmax(r, axis=0)
    out = (h * r[0][:, None, None, None, :]
           + w * r[1][:, None, None, None, :]
           + d * r[2][:, None, None, None, :])
    return out @ Wp.T + bp


# ----------------------------------- main ------------------------------------- #

if __name__ == "__main__":
    hwd = 8            # W == H == D == hwd (required by the module)
    dim = 16           # channels; segment_dim = dim // hwd = 2
    out_dim = 16
    B = 4              # batch-blocked: bblk=2 -> 2 parallel grid steps (v7x-friendly)

    key = jax.random.PRNGKey(0)
    ks = jax.random.split(key, 14)

    def lin(kw, kb, out_f, in_f):
        s = 1.0 / float(np.sqrt(in_f))
        Wm = jax.random.uniform(kw, (out_f, in_f), jnp.float32, -s, s)
        bv = jax.random.uniform(kb, (out_f,), jnp.float32, -s, s)
        return Wm, bv

    Wh, bh = lin(ks[0], ks[1], hwd, hwd)           # mlp_h (CCS)
    Ww, bw = lin(ks[2], ks[3], hwd, hwd)           # mlp_w (CCS)
    Wd, bd = lin(ks[4], ks[5], hwd, hwd)           # mlp_d (CCS)
    W1, b1 = lin(ks[6], ks[7], dim // 4, dim)      # reweight.fc1
    W2, b2 = lin(ks[8], ks[9], dim * 3, dim // 4)  # reweight.fc2
    Wp, bp = lin(ks[10], ks[11], out_dim, dim)     # proj

    params = dict(hwd=hwd, Wh=Wh, bh=bh, Ww=Ww, bw=bw, Wd=Wd, bd=bd,
                  W1=W1, b1=b1, W2=W2, b2=b2, Wp=Wp, bp=bp)

    x = jax.random.normal(ks[12], (B, hwd, hwd, hwd, dim), jnp.float32)

    out = weighted_permute_mlp_3d(x, params)
    out = jax.block_until_ready(out)

    ref = reference(x, params)
    # Tolerance accounts for bf16 MXU operands (f32 accumulation), the A&S erf approx,
    # and the approx EUP reciprocal in the softmax — all well inside 3e-2.
    np.testing.assert_allclose(np.asarray(out), np.asarray(ref), rtol=3e-2, atol=3e-2)
    print("KERNEL_OK")
</pallas_src>

<mosaic_0001>
module attributes {stable_mosaic.version = 11 : i64} {
  func.func @_fused_kernel(%arg0: i32, %arg1: memref<2x64x128xbf16, #tpu.memory_space<vmem>>, %arg2: memref<128x64xbf16, #tpu.memory_space<vmem>>, %arg3: memref<128x128xf32, #tpu.memory_space<vmem>>, %arg4: memref<128x128xbf16, #tpu.memory_space<vmem>>, %arg5: memref<1x128xf32, #tpu.memory_space<vmem>>, %arg6: memref<128x4xf32, #tpu.memory_space<vmem>>, %arg7: memref<1x4xf32, #tpu.memory_space<vmem>>, %arg8: memref<4x384xf32, #tpu.memory_space<vmem>>, %arg9: memref<1x384xf32, #tpu.memory_space<vmem>>, %arg10: memref<128x128xbf16, #tpu.memory_space<vmem>>, %arg11: memref<1x128xf32, #tpu.memory_space<vmem>>, %arg12: memref<2x64x128xf32, #tpu.memory_space<vmem>>) attributes {dimension_semantics = [#tpu.dimension_semantics<parallel>], iteration_bounds = array<i64: 2>, scalar_prefetch = 0 : i64, scratch_operands = 0 : i64, tpu.core_type = #tpu.core_type<tc>, window_params = [{transform_indices = @transform_0, window_bounds = array<i64: 2, 64, 128>}, {pipeline_mode = #tpu.pipeline_mode<synchronous>, transform_indices = @transform_1, window_bounds = array<i64: 128, 64>}, {pipeline_mode = #tpu.pipeline_mode<synchronous>, transform_indices = @transform_2, window_bounds = array<i64: 128, 128>}, {pipeline_mode = #tpu.pipeline_mode<synchronous>, transform_indices = @transform_3, window_bounds = array<i64: 128, 128>}, {pipeline_mode = #tpu.pipeline_mode<synchronous>, transform_indices = @transform_4, window_bounds = array<i64: 1, 128>}, {pipeline_mode = #tpu.pipeline_mode<synchronous>, transform_indices = @transform_5, window_bounds = array<i64: 128, 4>}, {pipeline_mode = #tpu.pipeline_mode<synchronous>, transform_indices = @transform_6, window_bounds = array<i64: 1, 4>}, {pipeline_mode = #tpu.pipeline_mode<synchronous>, transform_indices = @transform_7, window_bounds = array<i64: 4, 384>}, {pipeline_mode = #tpu.pipeline_mode<synchronous>, transform_indices = @transform_8, window_bounds = array<i64: 1, 384>}, {pipeline_mode = #tpu.pipeline_mode<synchronous>, transform_indices = @transform_9, window_bounds = array<i64: 128, 128>}, {pipeline_mode = #tpu.pipeline_mode<synchronous>, transform_indices = @transform_10, window_bounds = array<i64: 1, 128>}, {transform_indices = @transform_11, window_bounds = array<i64: 2, 64, 128>}]} {
    %c0 = arith.constant 0 : index
    %c0_0 = arith.constant 0 : index
    %c0_1 = arith.constant 0 : index
    %0 = vector.load %arg1[%c0, %c0_0, %c0_1] : memref<2x64x128xbf16, #tpu.memory_space<vmem>>, vector<2x64x128xbf16>
    %1 = vector.shape_cast %0 : vector<2x64x128xbf16> to vector<128x128xbf16>
    %c0_2 = arith.constant 0 : index
    %c0_3 = arith.constant 0 : index
    %2 = vector.load %arg2[%c0_2, %c0_3] : memref<128x64xbf16, #tpu.memory_space<vmem>>, vector<128x64xbf16>
    %3 = vector.shape_cast %2 : vector<128x64xbf16> to vector<1x128x64xbf16>
    %4 = vector.broadcast %3 : vector<1x128x64xbf16> to vector<2x128x64xbf16>
    %cst = arith.constant dense<0.000000e+00> : vector<2x128x128xf32>
    %5 = tpu.matmul %4, %0, %cst {dimension_numbers = #tpu.dot_dimension_numbers<[2], [1], [1], [2], [0, 0, 0, 1, 1, 2], [0], [0]>} : vector<2x128x64xbf16>, vector<2x64x128xbf16>, vector<2x128x128xf32> -> vector<2x128x128xf32>
    %c0_4 = arith.constant 0 : index
    %c0_5 = arith.constant 0 : index
    %6 = vector.load %arg3[%c0_4, %c0_5] : memref<128x128xf32, #tpu.memory_space<vmem>>, vector<128x128xf32>
    %7 = vector.shape_cast %6 : vector<128x128xf32> to vector<1x128x128xf32>
    %8 = vector.broadcast %7 : vector<1x128x128xf32> to vector<2x128x128xf32>
    %9 = arith.addf %5, %8 : vector<2x128x128xf32>
    %10 = vector.extract_strided_slice %9 {offsets = [0, 0, 0], sizes = [2, 64, 128], strides = [1, 1, 1]} : vector<2x128x128xf32> to vector<2x64x128xf32>
    %11 = vector.extract_strided_slice %9 {offsets = [0, 64, 0], sizes = [2, 64, 128], strides = [1, 1, 1]} : vector<2x128x128xf32> to vector<2x64x128xf32>
    %c0_6 = arith.constant 0 : index
    %c0_7 = arith.constant 0 : index
    %12 = vector.load %arg4[%c0_6, %c0_7] : memref<128x128xbf16, #tpu.memory_space<vmem>>, vector<128x128xbf16>
    %cst_8 = arith.constant dense<0.000000e+00> : vector<128x128xf32>
    %13 = tpu.matmul %1, %12, %cst_8 {dimension_numbers = #tpu.dot_dimension_numbers<[1], [0], [0], [1], [0, 0, 1, 1], [], []>} : vector<128x128xbf16>, vector<128x128xbf16>, vector<128x128xf32> -> vector<128x128xf32>
    %c0_9 = arith.constant 0 : index
    %c0_10 = arith.constant 0 : index
    %14 = vector.load %arg5[%c0_9, %c0_10] : memref<1x128xf32, #tpu.memory_space<vmem>>, vector<1x128xf32>
    %15 = vector.broadcast %14 : vector<1x128xf32> to vector<128x128xf32>
    %16 = arith.addf %13, %15 : vector<128x128xf32>
    %17 = vector.shape_cast %16 : vector<128x128xf32> to vector<2x64x128xf32>
    %18 = arith.addf %10, %11 : vector<2x64x128xf32>
    %19 = arith.addf %18, %17 : vector<2x64x128xf32>
    %cst_11 = arith.constant dense<0.000000e+00> : vector<2x128xf32>
    %20 = vector.multi_reduction <add>, %19, %cst_11 [1] : vector<2x64x128xf32> to vector<2x128xf32>
    %c0_12 = arith.constant 0 : index
    %c0_13 = arith.constant 0 : index
    %21 = vector.load %arg6[%c0_12, %c0_13] : memref<128x4xf32, #tpu.memory_space<vmem>>, vector<128x4xf32>
    %cst_14 = arith.constant dense<0.000000e+00> : vector<2x4xf32>
    %22 = tpu.matmul %20, %21, %cst_14 {dimension_numbers = #tpu.dot_dimension_numbers<[1], [0], [0], [1], [0, 0, 1, 1], [], []>} : vector<2x128xf32>, vector<128x4xf32>, vector<2x4xf32> -> vector<2x4xf32>
    %c0_15 = arith.constant 0 : index
    %c0_16 = arith.constant 0 : index
    %23 = vector.load %arg7[%c0_15, %c0_16] : memref<1x4xf32, #tpu.memory_space<vmem>>, vector<1x4xf32>
    %24 = vector.broadcast %23 : vector<1x4xf32> to vector<2x4xf32>
    %25 = arith.addf %22, %24 : vector<2x4xf32>
    %cst_17 = arith.constant 5.000000e-01 : f32
    %26 = vector.broadcast %cst_17 : f32 to vector<2x4xf32>
    %27 = arith.mulf %26, %25 : vector<2x4xf32>
    %cst_18 = arith.constant 0.707106769 : f32
    %28 = vector.broadcast %cst_18 : f32 to vector<2x4xf32>
    %29 = arith.mulf %25, %28 : vector<2x4xf32>
    %cst_19 = arith.constant 0.000000e+00 : f32
    %30 = vector.broadcast %cst_19 : f32 to vector<2x4xf32>
    %31 = arith.cmpf olt, %29, %30 : vector<2x4xf32>
    %cst_20 = arith.constant -1.000000e+00 : f32
    %cst_21 = arith.constant 1.000000e+00 : f32
    %32 = vector.broadcast %cst_20 : f32 to vector<2x4xf32>
    %33 = vector.broadcast %cst_21 : f32 to vector<2x4xf32>
    %34 = arith.select %31, %32, %33 : vector<2x4xi1>, vector<2x4xf32>
    %35 = math.absf %29 : vector<2x4xf32>
    %cst_22 = arith.constant 0.327591091 : f32
    %36 = vector.broadcast %cst_22 : f32 to vector<2x4xf32>
    %37 = arith.mulf %36, %35 : vector<2x4xf32>
    %cst_23 = arith.constant 1.000000e+00 : f32
    %38 = vector.broadcast %cst_23 : f32 to vector<2x4xf32>
    %39 = arith.addf %38, %37 : vector<2x4xf32>
    %cst_24 = arith.constant 1.000000e+00 : f32
    %40 = vector.broadcast %cst_24 : f32 to vector<2x4xf32>
    %41 = arith.divf %40, %39 : vector<2x4xf32>
    %cst_25 = arith.constant 1.06140542 : f32
    %42 = vector.broadcast %cst_25 : f32 to vector<2x4xf32>
    %43 = arith.mulf %42, %41 : vector<2x4xf32>
    %cst_26 = arith.constant -1.45315206 : f32
    %44 = vector.broadcast %cst_26 : f32 to vector<2x4xf32>
    %45 = arith.addf %43, %44 : vector<2x4xf32>
    %46 = arith.mulf %45, %41 : vector<2x4xf32>
    %cst_27 = arith.constant 1.42141378 : f32
    %47 = vector.broadcast %cst_27 : f32 to vector<2x4xf32>
    %48 = arith.addf %46, %47 : vector<2x4xf32>
    %49 = arith.mulf %48, %41 : vector<2x4xf32>
    %cst_28 = arith.constant -0.284496725 : f32
    %50 = vector.broadcast %cst_28 : f32 to vector<2x4xf32>
    %51 = arith.addf %49, %50 : vector<2x4xf32>
    %52 = arith.mulf %51, %41 : vector<2x4xf32>
    %cst_29 = arith.constant 0.254829586 : f32
    %53 = vector.broadcast %cst_29 : f32 to vector<2x4xf32>
    %54 = arith.addf %52, %53 : vector<2x4xf32>
    %55 = arith.mulf %54, %41 : vector<2x4xf32>
    %cst_30 = arith.constant 0.000000e+00 : f32
    %56 = vector.broadcast %cst_30 : f32 to vector<2x4xf32>
    %57 = arith.subf %56, %35 : vector<2x4xf32>
    %58 = arith.mulf %57, %35 : vector<2x4xf32>
    %59 = math.exp %58 : vector<2x4xf32>
    %60 = arith.mulf %55, %59 : vector<2x4xf32>
    %cst_31 = arith.constant 1.000000e+00 : f32
    %61 = vector.broadcast %cst_31 : f32 to vector<2x4xf32>
    %62 = arith.subf %61, %60 : vector<2x4xf32>
    %63 = arith.mulf %34, %62 : vector<2x4xf32>
    %cst_32 = arith.constant 1.000000e+00 : f32
    %64 = vector.broadcast %cst_32 : f32 to vector<2x4xf32>
    %65 = arith.addf %64, %63 : vector<2x4xf32>
    %66 = arith.mulf %27, %65 : vector<2x4xf32>
    %c0_33 = arith.constant 0 : index
    %c0_34 = arith.constant 0 : index
    %67 = vector.load %arg8[%c0_33, %c0_34] : memref<4x384xf32, #tpu.memory_space<vmem>>, vector<4x384xf32>
    %cst_35 = arith.constant dense<0.000000e+00> : vector<2x384xf32>
    %68 = tpu.matmul %66, %67, %cst_35 {dimension_numbers = #tpu.dot_dimension_numbers<[1], [0], [0], [1], [0, 0, 1, 1], [], []>} : vector<2x4xf32>, vector<4x384xf32>, vector<2x384xf32> -> vector<2x384xf32>
    %c0_36 = arith.constant 0 : index
    %c0_37 = arith.constant 0 : index
    %69 = vector.load %arg9[%c0_36, %c0_37] : memref<1x384xf32, #tpu.memory_space<vmem>>, vector<1x384xf32>
    %70 = vector.broadcast %69 : vector<1x384xf32> to vector<2x384xf32>
    %71 = arith.addf %68, %70 : vector<2x384xf32>
    %72 = vector.extract_strided_slice %71 {offsets = [0, 0], sizes = [2, 128], strides = [1, 1]} : vector<2x384xf32> to vector<2x128xf32>
    %73 = vector.extract_strided_slice %71 {offsets = [0, 128], sizes = [2, 128], strides = [1, 1]} : vector<2x384xf32> to vector<2x128xf32>
    %74 = vector.extract_strided_slice %71 {offsets = [0, 256], sizes = [2, 128], strides = [1, 1]} : vector<2x384xf32> to vector<2x128xf32>
    %75 = arith.maximumf %72, %73 : vector<2x128xf32>
    %76 = arith.maximumf %75, %74 : vector<2x128xf32>
    %77 = arith.subf %72, %76 : vector<2x128xf32>
    %78 = math.exp %77 : vector<2x128xf32>
    %79 = arith.subf %73, %76 : vector<2x128xf32>
    %80 = math.exp %79 : vector<2x128xf32>
    %81 = arith.subf %74, %76 : vector<2x128xf32>
    %82 = math.exp %81 : vector<2x128xf32>
    %83 = arith.addf %78, %80 : vector<2x128xf32>
    %84 = arith.addf %83, %82 : vector<2x128xf32>
    %85 = tpu.reciprocal %84 {approx = true} : vector<2x128xf32> -> vector<2x128xf32>
    %86 = arith.mulf %78, %85 : vector<2x128xf32>
    %87 = vector.shape_cast %86 : vector<2x128xf32> to vector<2x1x128xf32>
    %88 = arith.mulf %80, %85 : vector<2x128xf32>
    %89 = vector.shape_cast %88 : vector<2x128xf32> to vector<2x1x128xf32>
    %90 = arith.mulf %82, %85 : vector<2x128xf32>
    %91 = vector.shape_cast %90 : vector<2x128xf32> to vector<2x1x128xf32>
    %92 = vector.broadcast %87 : vector<2x1x128xf32> to vector<2x64x128xf32>
    %93 = arith.mulf %10, %92 : vector<2x64x128xf32>
    %94 = vector.broadcast %89 : vector<2x1x128xf32> to vector<2x64x128xf32>
    %95 = arith.mulf %11, %94 : vector<2x64x128xf32>
    %96 = arith.addf %93, %95 : vector<2x64x128xf32>
    %97 = vector.broadcast %91 : vector<2x1x128xf32> to vector<2x64x128xf32>
    %98 = arith.mulf %17, %97 : vector<2x64x128xf32>
    %99 = arith.addf %96, %98 : vector<2x64x128xf32>
    %100 = vector.shape_cast %99 : vector<2x64x128xf32> to vector<128x128xf32>
    %101 = arith.truncf %100 : vector<128x128xf32> to vector<128x128xbf16>
    %c0_38 = arith.constant 0 : index
    %c0_39 = arith.constant 0 : index
    %102 = vector.load %arg10[%c0_38, %c0_39] : memref<128x128xbf16, #tpu.memory_space<vmem>>, vector<128x128xbf16>
    %cst_40 = arith.constant dense<0.000000e+00> : vector<128x128xf32>
    %103 = tpu.matmul %101, %102, %cst_40 {dimension_numbers = #tpu.dot_dimension_numbers<[1], [0], [0], [1], [0, 0, 1, 1], [], []>} : vector<128x128xbf16>, vector<128x128xbf16>, vector<128x128xf32> -> vector<128x128xf32>
    %c0_41 = arith.constant 0 : index
    %c0_42 = arith.constant 0 : index
    %104 = vector.load %arg11[%c0_41, %c0_42] : memref<1x128xf32, #tpu.memory_space<vmem>>, vector<1x128xf32>
    %105 = vector.broadcast %104 : vector<1x128xf32> to vector<128x128xf32>
    %106 = arith.addf %103, %105 : vector<128x128xf32>
    %107 = vector.shape_cast %106 : vector<128x128xf32> to vector<2x64x128xf32>
    %c0_43 = arith.constant 0 : index
    %c0_44 = arith.constant 0 : index
    %c0_45 = arith.constant 0 : index
    %108 = vector.load %arg12[%c0_43, %c0_44, %c0_45] : memref<2x64x128xf32, #tpu.memory_space<vmem>>, vector<2x64x128xf32>
    tpu.vector_store %arg12[%c0_43, %c0_44, %c0_45], %107 {strides = array<i32>} : memref<2x64x128xf32, #tpu.memory_space<vmem>>, vector<2x64x128xf32>,
    return
  }
  func.func @transform_0(%arg0: i32) -> (i32, i32, i32) {
    %c0_i32 = arith.constant 0 : i32
    %c0_i32_0 = arith.constant 0 : i32
    %c0_i32_1 = arith.constant 0 : i32
    return %arg0, %c0_i32, %c0_i32_0 : i32, i32, i32
  }
  func.func @transform_1(%arg0: i32) -> (i32, i32) {
    %c0_i32 = arith.constant 0 : i32
    %c0_i32_0 = arith.constant 0 : i32
    %c0_i32_1 = arith.constant 0 : i32
    return %c0_i32, %c0_i32_0 : i32, i32
  }
  func.func @transform_2(%arg0: i32) -> (i32, i32) {
    %c0_i32 = arith.constant 0 : i32
    %c0_i32_0 = arith.constant 0 : i32
    %c0_i32_1 = arith.constant 0 : i32
    return %c0_i32, %c0_i32_0 : i32, i32
  }
  func.func @transform_3(%arg0: i32) -> (i32, i32) {
    %c0_i32 = arith.constant 0 : i32
    %c0_i32_0 = arith.constant 0 : i32
    %c0_i32_1 = arith.constant 0 : i32
    return %c0_i32, %c0_i32_0 : i32, i32
  }
  func.func @transform_4(%arg0: i32) -> (i32, i32) {
    %c0_i32 = arith.constant 0 : i32
    %c0_i32_0 = arith.constant 0 : i32
    %c0_i32_1 = arith.constant 0 : i32
    return %c0_i32, %c0_i32_0 : i32, i32
  }
  func.func @transform_5(%arg0: i32) -> (i32, i32) {
    %c0_i32 = arith.constant 0 : i32
    %c0_i32_0 = arith.constant 0 : i32
    %c0_i32_1 = arith.constant 0 : i32
    return %c0_i32, %c0_i32_0 : i32, i32
  }
  func.func @transform_6(%arg0: i32) -> (i32, i32) {
    %c0_i32 = arith.constant 0 : i32
    %c0_i32_0 = arith.constant 0 : i32
    %c0_i32_1 = arith.constant 0 : i32
    return %c0_i32, %c0_i32_0 : i32, i32
  }
  func.func @transform_7(%arg0: i32) -> (i32, i32) {
    %c0_i32 = arith.constant 0 : i32
    %c0_i32_0 = arith.constant 0 : i32
    %c0_i32_1 = arith.constant 0 : i32
    return %c0_i32, %c0_i32_0 : i32, i32
  }
  func.func @transform_8(%arg0: i32) -> (i32, i32) {
    %c0_i32 = arith.constant 0 : i32
    %c0_i32_0 = arith.constant 0 : i32
    %c0_i32_1 = arith.constant 0 : i32
    return %c0_i32, %c0_i32_0 : i32, i32
  }
  func.func @transform_9(%arg0: i32) -> (i32, i32) {
    %c0_i32 = arith.constant 0 : i32
    %c0_i32_0 = arith.constant 0 : i32
    %c0_i32_1 = arith.constant 0 : i32
    return %c0_i32, %c0_i32_0 : i32, i32
  }
  func.func @transform_10(%arg0: i32) -> (i32, i32) {
    %c0_i32 = arith.constant 0 : i32
    %c0_i32_0 = arith.constant 0 : i32
    %c0_i32_1 = arith.constant 0 : i32
    return %c0_i32, %c0_i32_0 : i32, i32
  }
  func.func @transform_11(%arg0: i32) -> (i32, i32, i32) {
    %c0_i32 = arith.constant 0 : i32
    %c0_i32_0 = arith.constant 0 : i32
    %c0_i32_1 = arith.constant 0 : i32
    return %arg0, %c0_i32, %c0_i32_0 : i32, i32, i32
  }
}

</mosaic_0001>

<bundles_post_ra>
// kernel: tpu_custom_call.1
= control target key start
LH: loop header
LB: loop body
LE: loop exit
PB: predicated region body
PF: predicated region fallthrough
CT: control target
= control target key end

     0   :  { %s2525_s0 = inlined_call_operand.vmem [shape: bf16[4,64,128], index: 0, kind: input, shape index: {}]   ;;  %s2526_s1 = inlined_call_operand.vmem [shape: bf16[128,64], index: 1, kind: input, shape index: {}]   ;;  %s2527_s2 = inlined_call_operand.hbm [shape: f32[128,128], index: 2, kind: input, shape index: {}]   ;;  %s2528_s3 = inlined_call_operand.vmem [shape: bf16[128,128], index: 3, kind: input, shape index: {}]   ;;  %s2529_s4 = inlined_call_operand.vmem [shape: f32[1,128], index: 4, kind: input, shape index: {}]   ;;  %s2530_s5 = inlined_call_operand.vmem [shape: f32[128,4], index: 5, kind: input, shape index: {}]   ;;  %s2531_s6 = inlined_call_operand.vmem [shape: f32[1,4], index: 6, kind: input, shape index: {}]   ;;  %s2532_s7 = inlined_call_operand.vmem [shape: f32[4,384], index: 7, kind: input, shape index: {}]   ;;  %s2533_s8 = inlined_call_operand.vmem [shape: f32[1,384], index: 8, kind: input, shape index: {}]   ;;  %s2534_s9 = inlined_call_operand.hbm [shape: bf16[128,128], index: 9, kind: input, shape index: {}]   ;;  %s2535_s10 = inlined_call_operand.vmem [shape: f32[1,128], index: 10, kind: input, shape index: {}]   ;;  %s2536_s11 = inlined_call_operand.hbm [shape: f32[4,64,128], index: 11, kind: output, shape index: {}]  }
   0x1   :  { %2551 = sst [smem:[#allocation26_spill]] %s2527_s2 }
   0x2   :  { %16 = vsyncpa [#allocation3], 0 }
   0x3   :  { %17 = vsyncpa [#allocation6], 0 }
   0x4   :  { %18 = vsyncpa [#allocation4], 0 }
   0x5   :  { %20 = vsyncpa [#allocation4 + $0x1], 0  ;;  %s1885_s17 = smov 0   ;;  %s1887_s18 = smov 0  }
   0x6   :  { %s1889_s19 = smov 0   ;;  %s1891_s20 = smov 0  }
   0x7 LB: > { %2552 = sst [smem:[#allocation11_spill]] %s1810_s19  ;;  %s1906_s21 = sadd.s32 4294967295, %s1814_s20   ;;  %s1814_s20 = sphi %s1891_s20, %s2589_s20   ;;  %s1810_s19 = sphi %s1889_s19, %s2588_s19   ;;  %s1806_s18 = sphi %s1887_s18, %s2587_s18   ;;  %s1802_s17 = sphi %s1885_s17, %s2586_s17  }
   0x8   : > { %s1391_s22 = sadd.s32 4294967294, %s1814_s20   ;;  %s1910_s23 = sadd.s32 1, %s1814_s20  }
   0x9   : > { %s269_s24 = sadd.s32 1, %s1810_s19  ;;  %s266_s25 = ssub.s32 %s1814_s20, %s1910_s23 }
   0xa   : > { %p279_p0 = scmp.ne.s32.totalorder %s1810_s19, %s1806_s18  ;;  %p267_p1 = scmp.eq.s32.totalorder %s266_s25, 0 }
   0xb   : > { %p280_p2 = scmp.eq.s32.totalorder %s1906_s21, 1  ;;  %p285_p3 = scmp.ne.s32.totalorder %s1806_s18, %s1802_s17 }
   0xc   : > { %p286_p4 = scmp.eq.s32.totalorder %s1391_s22, 1  ;;  %p1392_p7 = scmp.ge.s32.totalorder %s1814_s20, 1 }
   0xd   : > { %s1921_s26 = scalar_select %p267_p1, %s1810_s19, %s269_s24  }
   0xe   : > { %p1923_p5 = por %p280_p2, %p279_p0  ;;  %p1927_p6 = por %p286_p4, %p285_p3 }
   0xf   : > { %2553 = sst [smem:[#allocation12_spill]] %s1921_s26  ;;  %p293_p8 = scmp.lt.s32.totalorder %s1814_s20, 3 }
  0x10   : > { %p1623_p9 = scmp.eq.s32.totalorder %s1906_s21, 0  ;;  %s2557_s2 = sld [smem:[#allocation26_spill]] }
  0x11   : > { %p1934_p10 = pnand %p1392_p7, %p293_p8  ;;  %s1816_s14 = smov [#allocation2]  }
  0x12   : > { %s309_s15 = sshll.u32 %s1816_s14, 4  ;;  %s339_s24 = sshll.u32 %s2534_s9, 4  ;;  %s310_s15 = int_to_ptr.vmem [resolvable:$true] %s309_s15  ;;  %s340_s24 = int_to_ptr.hbm [resolvable:$true] %s339_s24 }
  0x13   : > { %p1612_p11 = pneg %p1934_p10  ;;  %s1817_s25 = smov 128  }
  0x14   : > { %s1818_s26 = smov 8   ;;  %s1819_s19 = smov [#allocation5]  }
  0x15   : > { %p1613_p12 = pnand %p1623_p9, %p1612_p11  ;;  %s341_s30 = sshll.u32 %s1819_s19, 4  ;;  %s342_s30 = int_to_ptr.vmem [resolvable:$true] %s341_s30 }
  0x16   : > { %s307_s13 = sshll.u32 %s2557_s2, 4  ;;  %s1820_s12 = smov 64   ;;  %s308_s13 = int_to_ptr.hbm [resolvable:$true] %s307_s13 }
  0x17   : > { %1615 = dma.hbm_to_vmem [thread:$0]  (!%p1613_p12), %s308_s13, 2048, %s310_s15, [#allocation3], %s1817_s25, %s1817_s25, %s1818_s26  }
  0x18   : > { %s1821_s2 = smov 4   ;;  %370 = sbr.rel (%p1934_p10) target bundleno = 939 (0x3ab), region = 64 }
  0x19   : > { %1618 = dma.hbm_to_vmem [thread:$0]  (!%p1613_p12), %s340_s24, 1024, %s342_s30, [#allocation6], %s1820_s12, %s1820_s12, %s1821_s2  }
  0x1d   : > { %1789 = dma.done.wait (%p1623_p9), [#allocation3], 2048  }
  0x1e   : > { %1791 = vsyncadd (%p1623_p9), [#allocation3], 4294965248 }
  0x1f   : > { %1793 = dma.done.wait (%p1623_p9), [#allocation6], 1024  }
  0x20   : > { %1795 = vsyncadd (%p1623_p9), [#allocation6], 4294966272  ;;  %s1400_s19 = sshll.u32 %s1906_s21, 1  ;;  %v1583_v2 = vld [vmem:[%s2528_s3 + $0x38] sm:$0xff]  ;;  %v1582_v5 = vld [vmem:[%s2528_s3 + $0x30] sm:$0xff]  ;;  %vm538_vm0 = vcmask 523264  }
  0x21   : > { %p418_p13 = scmp.lt.s32.totalorder %s1400_s19, 3  ;;  %753 = vmatpush.bf16.msra.mxu2 %v1583_v2  ;;  %v1581_v8 = vld [vmem:[%s2528_s3 + $0x28] sm:$0xff]  ;;  %v1580_v11 = vld [vmem:[%s2528_s3 + $0x20] sm:$0xff]  ;;  %v1579_v13 = vld [vmem:[%s2528_s3 + $0x18] sm:$0xff]  ;;  %vm882_vm1 = vcmask 1041409   ;;  %vm967_vm3 = vcmask 1043456  }
  0x22   : > { %v1568_v12 = vld [vmem:[%s2526_s1] sm:$0xff]  ;;  %v1578_v14 = vld [vmem:[%s2528_s3 + $0x10] sm:$0xff]  ;;  %v1577_v15 = vld [vmem:[%s2528_s3 + $0x8] sm:$0xff]  ;;  %vm963_vm8 = vcmask 31744   ;;  %s1593_s15 = sshll.u32 %s1906_s21, 7 }
  0x23   : > { %s2591_s19 = smov (!%p418_p13, %s1400_s19), 3  ;;  %v1576_v16 = vld [vmem:[%s2528_s3] sm:$0xff]  ;;  %v1569_v17 = vld [vmem:[%s2526_s1 + $0x8] sm:$0xff]  ;;  %v1570_v18 = vld [vmem:[%s2526_s1 + $0x10] sm:$0xff]  ;;  %s1303_s24 = scalar_lea.hbm %s2536_s11, %s1593_s15 }
  0x24   : > { %s1559_s2 = sshll.u32 %s2591_s19, 5  ;;  %v1571_v19 = vld [vmem:[%s2526_s1 + $0x18] sm:$0xff]  ;;  %v1572_v20 = vld [vmem:[%s2526_s1 + $0x20] sm:$0xff]  ;;  %v1573_v21 = vld [vmem:[%s2526_s1 + $0x28] sm:$0xff]  ;;  %s1306_s30 = sshll.u32 %s1303_s24, 4  ;;  %s1307_s30 = int_to_ptr.hbm [resolvable:$true] %s1306_s30 }
  0x25   : > { %s422_s13 = scalar_lea.vmem %s2525_s0, %s1559_s2  ;;  %754 = vmatpush.bf16.msra.mxu2 %v1582_v5  ;;  %v1574_v22 = vld [vmem:[%s2526_s1 + $0x30] sm:$0xff]  ;;  %v1575_v23 = vld [vmem:[%s2526_s1 + $0x38] sm:$0xff]  ;;  %v873_v32 = vld [vmem:[%s2530_s5 + $0x68] sm:$0xff]  ;;  %s414_s2 = sand.u32 1, %s1806_s18  }
  0x26   : > { %v1563_v0 = vld [vmem:[%s422_s13 + $0x18] sm:$0xff]  ;;  %v1562_v3 = vld [vmem:[%s422_s13 + $0x10] sm:$0xff]  ;;  %v1561_v6 = vld [vmem:[%s422_s13 + $0x8] sm:$0xff]  ;;  %s1399_s26 = sshll.u32 %s414_s2, 7  ;;  %s1291_s12 = scalar_lea.sflag [#allocation4], %s414_s2 }
  0x27   : > { %v1962_v1 = vld [vmem:[%s422_s13 + $0x38] sm:$0xff]  ;;  %567 = vmatpush.bf16.msra.mxu0 %v1563_v0  ;;  %v1566_v4 = vld [vmem:[%s422_s13 + $0x30] sm:$0xff]  ;;  %v1565_v7 = vld [vmem:[%s422_s13 + $0x28] sm:$0xff]  ;;  %s2473_s14 = scalar_lea.vmem [#allocation7], %s1399_s26  ;;  %s1758_s19 = sshra.s32 %s1307_s30, 4  ;;  %s1759_s19 = int_to_ptr.hbm [resolvable:$true] %s1758_s19 }
  0x28   : > { %640 = vmatpush.bf16.msra.mxu1 %v1962_v1  ;;  %v1560_v9 = vld [vmem:[%s422_s13] sm:$0xff]  ;;  %v875_v26 = vld [vmem:[%s2530_s5 + $0x78] sm:$0xff]  ;;  %v874_v29 = vld [vmem:[%s2530_s5 + $0x70] sm:$0xff]  ;;  %s1304_s25 = sshll.u32 %s2473_s14, 4  ;;  %s1760_s26 = scalar_lea.hbm %s1759_s19, 128  ;;  %s1305_s25 = int_to_ptr.vmem [resolvable:$true] %s1304_s25 }
  0x29   : > { %v1564_v10 = vld [vmem:[%s422_s13 + $0x20] sm:$0xff]  ;;  %755 = vmatpush.bf16.msra.mxu2 %v1581_v8  ;;  %v871_v40 = vld [vmem:[%s2530_s5 + $0x58] sm:$0xff]  ;;  %v870_v45 = vld [vmem:[%s2530_s5 + $0x50] sm:$0xff]  ;;  %p1761_p0 = scmp.ne.s32.totalorder %s1759_s19, %s1760_s26  ;;  %s1764_s13 = scalar_lea.hbm %s2536_s11, 256 }
  0x2a   : > { %v872_v36 = vld [vmem:[%s2530_s5 + $0x60] sm:$0xff]  ;;  %v869_v49 = vld [vmem:[%s2530_s5 + $0x48] sm:$0xff]  ;;  %v867_v57 = vld [vmem:[%s2530_s5 + $0x38] sm:$0xff]  ;;  %p1765_p3 = scmp.lt.s32.totalorder %s1759_s19, %s2536_s11  ;;  %p1766_p4 = scmp.lt.s32.totalorder %s1764_s13, %s1760_s26 }
  0x2b   : > { %568 = vmatpush.bf16.msra.mxu0 %v1562_v3  ;;  %v868_v53 = vld [vmem:[%s2530_s5 + $0x40] sm:$0xff]  ;;  %v866_v61 = vld [vmem:[%s2530_s5 + $0x30] sm:$0xff]  ;;  %p1762_p1 = pnand %p1761_p0, %p1923_p5 }
  0x2c   : > { %641 = vmatpush.bf16.msra.mxu1 %v1566_v4  ;;  %p1767_p7 = por %p1766_p4, %p1765_p3 }
  0x2d   : > { %756 = vmatpush.bf16.msra.mxu2 %v1580_v11  ;;  %v862_v11 = vld [vmem:[%s2530_s5 + $0x10] sm:$0xff]  ;;  %p1763_p2 = pneg %p1762_p1 }
  0x2f   : > { %569 = vmatpush.bf16.msra.mxu0 %v1561_v6  ;;  %p1768_p8 = pnand %p1767_p7, %p1763_p2 }
  0x30   : > { %642 = vmatpush.bf16.msra.mxu1 %v1565_v7 }
  0x31   : > { %757 = vmatpush.bf16.msra.mxu2 %v1579_v13  ;;  %v2136_v13 = vld [vmem:[#allocation2 + $0x8] sm:$0xff] }
  0x33   : > { %570 = vmatpush.bf16.msra.mxu0 %v1560_v9 }
  0x34   : > { %643 = vmatpush.bf16.msra.mxu1 %v1564_v10 }
  0x35   : > { %758 = vmatpush.bf16.msra.mxu2 %v1578_v14  ;;  %v2138_v14 = vld [vmem:[#allocation2 + $0x40] sm:$0xff] }
  0x36   : > { %1451 = vmatmul.msk.bf16.vlgmr.msra.gmra.mxu0 %vm538_vm0, %v1568_v12 }
  0x37   : > { %1475 = vmatmul.msk.bf16.vlgmr.msra.gmra.mxu1 %vm538_vm0, %v1568_v12  ;;  %885 = vmatpush.msrb.mxu0 %v875_v26  ;;  %v467_v12 = vld [vmem:[#allocation2 + $0x48] sm:$0xff] }
  0x39   : > { %759 = vmatpush.bf16.msra.mxu2 %v1577_v15  ;;  %886 = vmatpush.msrb.mxu0 %v874_v29  ;;  %v2140_v15 = vld [vmem:[#allocation2 + $0x50] sm:$0xff] }
  0x3b   : > { %887 = vmatpush.msrb.mxu0 %v873_v32  ;;  %v2165_v32 = vld [vmem:[%s2529_s4] ss:$0 sm:$0xff] }
  0x3d   : > { %760 = vmatpush.bf16.msra.mxu2 %v1576_v16  ;;  %888 = vmatpush.msrb.mxu0 %v872_v36  ;;  %v2167_v36 = vld [vmem:[#allocation2 + $0x60] sm:$0xff] }
  0x3f   : > { %889 = vmatpush.msrb.mxu0 %v871_v40 }
  0x40   : > { %761 = vmatmul.bf16.vlgmr.msra.gmra.mxu2 %v1560_v9 }
  0x41   : > { %890 = vmatpush.msrb.mxu0 %v870_v45  ;;  %v2176_v45 = vld [vmem:[#allocation2 + $0x20] sm:$0xff] }
  0x43   : > { %891 = vmatpush.msrb.mxu0 %v869_v49 }
  0x45   : > { %892 = vmatpush.msrb.mxu0 %v868_v53 }
  0x46   : > { %1452 = vmatmul.msk.bf16.gmra.mxu0 %vm538_vm0, %v1569_v17 }
  0x47   : > { %1476 = vmatmul.msk.bf16.gmra.mxu1 %vm538_vm0, %v1569_v17  ;;  %893 = vmatpush.msrb.mxu0 %v867_v57  ;;  %v2187_v57 = vld [vmem:[#allocation2 + $0x68] sm:$0xff] }
  0x49   : > { %894 = vmatpush.msrb.mxu0 %v866_v61 }
  0x50   : > { %766 = vmatmul.bf16.gmra.mxu2 %v1561_v6  ;;  %v864_v6 = vld [vmem:[%s2530_s5 + $0x20] sm:$0xff] }
  0x56   : > { %1453 = vmatmul.msk.bf16.gmra.mxu0 %vm538_vm0, %v1570_v18 }
  0x57   : > { %1477 = vmatmul.msk.bf16.gmra.mxu1 %vm538_vm0, %v1570_v18 }
  0x60   : > { %771 = vmatmul.bf16.gmra.mxu2 %v1562_v3 }
  0x66   : > { %1454 = vmatmul.msk.bf16.gmra.mxu0 %vm538_vm0, %v1571_v19 }
  0x67   : > { %1478 = vmatmul.msk.bf16.gmra.mxu1 %vm538_vm0, %v1571_v19  ;;  %v458_v19 = vld [vmem:[#allocation2] sm:$0xff] }
  0x70   : > { %776 = vmatmul.bf16.gmra.mxu2 %v1563_v0 }
  0x76   : > { %1455 = vmatmul.msk.bf16.gmra.mxu0 %vm538_vm0, %v1572_v20 }
  0x77   : > { %1479 = vmatmul.msk.bf16.gmra.mxu1 %vm538_vm0, %v1572_v20  ;;  %v2146_v20 = vld [vmem:[#allocation2 + $0x10] sm:$0xff] }
  0x80   : > { %781 = vmatmul.bf16.gmra.mxu2 %v1564_v10 }
  0x86   : > { %1456 = vmatmul.msk.bf16.gmra.mxu0 %vm538_vm0, %v1573_v21 }
  0x87   : > { %1480 = vmatmul.msk.bf16.gmra.mxu1 %vm538_vm0, %v1573_v21  ;;  %v2148_v21 = vld [vmem:[#allocation2 + $0x58] sm:$0xff] }
  0x90   : > { %786 = vmatmul.bf16.gmra.mxu2 %v1565_v7  ;;  %v863_v7 = vld [vmem:[%s2530_s5 + $0x18] sm:$0xff] }
  0x96   : > { %1457 = vmatmul.msk.bf16.gmra.mxu0 %vm538_vm0, %v1574_v22 }
  0x97   : > { %1481 = vmatmul.msk.bf16.gmra.mxu1 %vm538_vm0, %v1574_v22 }
  0xa0   : > { %791 = vmatmul.bf16.gmra.mxu2 %v1566_v4 }
  0xa6   : > { %1458 = vmatmul.msk.bf16.gmra.mxu0 %vm538_vm0, %v1575_v23 }
  0xa7   : > { %1482 = vmatmul.msk.bf16.gmra.mxu1 %vm538_vm0, %v1575_v23  ;;  %v2154_v23 = vld [vmem:[#allocation2 + $0x18] sm:$0xff] }
  0xb0   : > { %796 = vmatmul.bf16.gmra.mxu2 %v1962_v1  ;;  %v865_v1 = vld [vmem:[%s2530_s5 + $0x28] sm:$0xff] }
  0xb1   : > { %895 = vmatpush.msrb.mxu0 %v865_v1 }
  0xb3   : > { %v2029_v24 = vpop.f32.mrf.mxu0  ;;  %896 = vmatpush.msrb.mxu0 %v864_v6 }
  0xb4   : > { %v2031_v25 = vpop.f32.mrf.mxu1  ;;  %v2170_v40 = vadd.f32 %v2029_v24, %v458_v19 }
  0xb5   : > { %897 = vmatpush.msrb.mxu0 %v863_v7 }
  0xb7   : > { %898 = vmatpush.msrb.mxu0 %v862_v11  ;;  %v2220_v11 = vld [vmem:[#allocation2 + $0x30] sm:$0xff] }
  0xbb   : > { %v2037_v27 = vpop.f32.mrf.mxu0 }
  0xbc   : > { %v2039_v28 = vpop.f32.mrf.mxu1  ;;  %v2152_v22 = vadd.f32 %v2037_v27, %v2136_v13 }
  0xc3   : > { %v2044_v30 = vpop.f32.mrf.mxu0  ;;  %v2051_v33 = vpop.f32.mrf.mxu2 }
  0xc4   : > { %v2046_v31 = vpop.f32.mrf.mxu1  ;;  %v2174_v27 = vadd.f32 %v2044_v30, %v2146_v20 }
  0xc6   : > { %2561 = vst [vmem:[#allocation16_spill] sm:$0xff] %v2174_v27 }
  0xcb   : > { %v2053_v34 = vpop.f32.mrf.mxu0  ;;  %v2060_v37 = vpop.f32.mrf.mxu2 }
  0xcc   : > { %v2055_v35 = vpop.f32.mrf.mxu1  ;;  %v2193_v30 = vadd.f32 %v2165_v32, %v2060_v37  ;;  %v2212_v37 = vld [vmem:[#allocation2 + $0x70] sm:$0xff] }
  0xce   : > { %2564 = vst [vmem:[#allocation19_spill] sm:$0xff] %v2193_v30 }
  0xd3   : > { %v2062_v38 = vpop.f32.mrf.mxu0  ;;  %v2069_v41 = vpop.f32.mrf.mxu2 }
  0xd4   : > { %v2064_v39 = vpop.f32.mrf.mxu1  ;;  %v2218_v7 = vadd.f32 %v2165_v32, %v2069_v41  ;;  %v2236_v41 = vld [vmem:[#allocation2 + $0x78] sm:$0xff] }
  0xd6   : > { %2567 = vst [vmem:[#allocation22_spill] sm:$0xff] %v2218_v7 }
  0xdb   : > { %v2071_v42 = vpop.f32.mrf.mxu0  ;;  %v2075_v44 = vpop.f32.mrf.mxu2 }
  0xdc   : > { %v2073_v43 = vpop.f32.mrf.mxu1 }
  0xe3   : > { %v2080_v46 = vpop.f32.mrf.mxu0  ;;  %v2084_v48 = vpop.f32.mrf.mxu2 }
  0xe4   : > { %v2082_v47 = vpop.f32.mrf.mxu1 }
  0xeb   : > { %v2089_v50 = vpop.f32.mrf.mxu0  ;;  %v2093_v52 = vpop.f32.mrf.mxu2 }
  0xec   : > { %v2091_v51 = vpop.f32.mrf.mxu1 }
  0xf3   : > { %v592_v54 = vpop.f32.mrf.mxu0  ;;  %v2100_v56 = vpop.f32.mrf.mxu2 }
  0xf4   : > { %v2098_v55 = vpop.f32.mrf.mxu1  ;;  %v2157_v26 = vadd.f32 %v592_v54, %v2138_v14  ;;  %v2185_v54 = vadd.f32 %v2053_v34, %v2154_v23  ;;  %v2206_v34 = vadd.f32 %v2165_v32, %v2051_v33 }
  0xf6   : > { %2559 = vst [vmem:[#allocation14_spill] sm:$0xff] %v2157_v26  ;;  %v802_v61 = vadd.f32 %v2157_v26, %v2170_v40  ;;  %v2238_v26 = vld [vmem:[#allocation2 + $0x38] sm:$0xff] }
  0xf7   : > { %2563 = vst [vmem:[#allocation18_spill] sm:$0xff] %v2185_v54 }
  0xfb   : > { %v594_v58 = vpop.f32.mrf.mxu0  ;;  %v2107_v60 = vpop.f32.mrf.mxu2 }
  0xfc   : > { %v2105_v59 = vpop.f32.mrf.mxu1  ;;  %v2144_v17 = vadd.f32 %v594_v58, %v467_v12  ;;  %v2195_v58 = vld [vmem:[#allocation2 + $0x28] sm:$0xff] }
  0xfe   : > { %2558 = vst [vmem:[#allocation13_spill] sm:$0xff] %v2144_v17  ;;  %v803_v49 = vadd.f32 %v2144_v17, %v2152_v22 }
 0x103   : > { %v597_v62 = vpop.f32.mrf.mxu0  ;;  %v2114_v0 = vpop.f32.mrf.mxu2 }
 0x104   : > { %v2112_v63 = vpop.f32.mrf.mxu1  ;;  %v2160_v29 = vadd.f32 %v597_v62, %v2140_v15 }
 0x106   : > { %2560 = vst [vmem:[#allocation15_spill] sm:$0xff] %v2160_v29  ;;  %v804_v62 = vadd.f32 %v2160_v29, %v2174_v27  ;;  %v2234_v27 = vadd.f32 %v2165_v32, %v2075_v44  ;;  %v860_v44 = vld [vmem:[%s2530_s5] sm:$0xff] }
 0x10b   : > { %v599_v2 = vpop.f32.mrf.mxu0  ;;  %v2119_v3 = vpop.f32.mrf.mxu2 }
 0x10c   : > { %v2121_v5 = vpop.f32.mrf.mxu1  ;;  %v2181_v53 = vadd.f32 %v599_v2, %v2148_v21  ;;  %v2210_v2 = vadd.f32 %v2062_v38, %v2176_v45  ;;  %v2230_v38 = vadd.f32 %v2071_v42, %v2195_v58  ;;  %v861_v42 = vld [vmem:[%s2530_s5 + $0x8] sm:$0xff] }
 0x10d   : > { %899 = vmatpush.msrb.mxu0 %v861_v42 }
 0x10e   : > { %2562 = vst [vmem:[#allocation17_spill] sm:$0xff] %v2181_v53  ;;  %v805_v33 = vadd.f32 %v2181_v53, %v2185_v54  ;;  %v820_v53 = vadd.f32 %v804_v62, %v2218_v7  ;;  %v2255_v54 = vadd.f32 %v2080_v46, %v2220_v11  ;;  %v2268_v7 = vadd.f32 %v2031_v25, %v458_v19 }
 0x10f   : > { %2566 = vst [vmem:[#allocation21_spill] sm:$0xff] %v2210_v2  ;;  %v2272_v46 = vadd.f32 %v2089_v50, %v2238_v26  ;;  %900 = vmatpush.msrb.mxu0 %v860_v44  ;;  %v2286_v25 = vadd.f32 %v2039_v28, %v2136_v13  ;;  %v2290_v50 = vadd.f32 %v2098_v55, %v2138_v14 }
 0x110   : > { %v2315_v13 = vadd.f32 %v2165_v32, %v2114_v0  ;;  %v2323_v14 = vadd.f32 %v2165_v32, %v2107_v60 }
 0x111   : > { %v810_v0 = vadd.f32 %v2290_v50, %v2268_v7 }
 0x113   : > { %v602_v4 = vpop.f32.mrf.mxu0  ;;  %v2129_v8 = vpop.f32.mrf.mxu2  ;;  %v826_v44 = vadd.f32 %v810_v0, %v2315_v13 }
 0x114   : > { %v2131_v10 = vpop.f32.mrf.mxu1  ;;  %v2202_v1 = vadd.f32 %v602_v4, %v2167_v36  ;;  %v819_v4 = vadd.f32 %v803_v49, %v2193_v30  ;;  %v818_v49 = vadd.f32 %v802_v61, %v2206_v34  ;;  %v2259_v61 = vadd.f32 %v2165_v32, %v2084_v48 }
 0x115   : > { %v2275_v48 = vadd.f32 %v2105_v59, %v467_v12  ;;  %v2294_v59 = vadd.f32 %v2165_v32, %v2100_v56  ;;  %v2309_v56 = vadd.f32 %v2046_v31, %v2146_v20  ;;  %v2327_v31 = vadd.f32 %v2165_v32, %v2129_v8 }
 0x116   : > { %2565 = vst [vmem:[#allocation20_spill] sm:$0xff] %v2202_v1  ;;  %v834_v62 = vadd.f32 %v819_v4, %v818_v49  ;;  %v2279_v4 = vadd.f32 %v2165_v32, %v2093_v52  ;;  %v2298_v52 = vadd.f32 %v2112_v63, %v2140_v15  ;;  %v2340_v60 = vadd.f32 %v2131_v10, %v2167_v36 }
 0x117   : > { %v811_v63 = vadd.f32 %v2275_v48, %v2286_v25 }
 0x11b   : > { %v604_v9 = vpop.f32.mrf.mxu0  ;;  %v2142_v16 = vpop.f32.mrf.mxu2 }
 0x11c   : > { %v2189_v24 = vpop.f32.mrf.mxu1  ;;  %v2226_v29 = vadd.f32 %v604_v9, %v2187_v57  ;;  %v806_v9 = vadd.f32 %v2202_v1, %v2210_v2  ;;  %v2345_v42 = vadd.f32 %v2165_v32, %v2142_v16 }
 0x11d   : > { %v2358_v36 = vadd.f32 %v2189_v24, %v2187_v57 }
 0x11e   : > { %v807_v1 = vadd.f32 %v2226_v29, %v2230_v38  ;;  %v822_v49 = vadd.f32 %v806_v9, %v2259_v61  ;;  %v2302_v9 = vadd.f32 %v2165_v32, %v2119_v3  ;;  %v2319_v3 = vadd.f32 %v2121_v5, %v2148_v21 }
 0x11f   : > { %v812_v5 = vadd.f32 %v2298_v52, %v2309_v56 }
 0x120   : > { %v823_v28 = vadd.f32 %v807_v1, %v2279_v4  ;;  %v2332_v1 = vadd.f32 %v2055_v35, %v2154_v23  ;;  %v827_v21 = vadd.f32 %v811_v63, %v2302_v9  ;;  %v2350_v23 = vadd.f32 %v2064_v39, %v2176_v45 }
 0x121   : > { %v828_v10 = vadd.f32 %v812_v5, %v2327_v31  ;;  %v2366_v39 = vadd.f32 %v2073_v43, %v2195_v58 }
 0x122   : > { %v814_v45 = vadd.f32 %v2340_v60, %v2350_v23 }
 0x123   : > { %v607_v18 = vpop.f32.mrf.mxu0  ;;  %v2214_v6 = vpop.f32.mrf.mxu2 }
 0x124   : > { %v2245_v30 = vadd.f32 %v607_v18, %v2212_v37  ;;  %v821_v18 = vadd.f32 %v805_v33, %v2234_v27  ;;  %v835_v33 = vadd.f32 %v834_v62, %v820_v53  ;;  %v680_v12 = vpop.f32.mrf.mxu1  ;;  %v813_v62 = vadd.f32 %v2319_v3, %v2332_v1 }
 0x125   : > { %v2362_v16 = vadd.f32 %v2165_v32, %v2214_v6  ;;  %v2379_v6 = vadd.f32 %v2082_v47, %v2220_v11  ;;  %v2395_v11 = vadd.f32 %v2091_v51, %v2238_v26 }
 0x126   : > { %v836_v53 = vadd.f32 %v835_v33, %v821_v18  ;;  %v2371_v33 = vadd.f32 %v680_v12, %v2212_v37  ;;  %v829_v57 = vadd.f32 %v813_v62, %v2345_v42 }
 0x127   : > { %v830_v37 = vadd.f32 %v814_v45, %v2362_v16 }
 0x128   : > { %v837_v15 = vadd.f32 %v836_v53, %v822_v49 }
 0x12a   : > { %v838_v8 = vadd.f32 %v837_v15, %v823_v28  ;;  %v815_v28 = vadd.f32 %v2358_v36, %v2366_v39 }
 0x12b   : > { %v609_v17 = vpop.f32.mrf.mxu0  ;;  %v794_v19 = vpop.f32.mrf.mxu2 }
 0x12c   : > { %v2265_v2 = vadd.f32 %v609_v17, %v2236_v41  ;;  %v808_v17 = vadd.f32 %v2245_v30, %v2255_v54  ;;  %v2375_v53 = vadd.f32 %v2165_v32, %v794_v19  ;;  %v682_v43 = vpop.f32.mrf.mxu1 }
 0x12d   : > { %v2390_v15 = vadd.f32 %v682_v43, %v2236_v41 }
 0x12e   : > { %v809_v55 = vadd.f32 %v2265_v2, %v2272_v46  ;;  %v824_v20 = vadd.f32 %v808_v17, %v2294_v59  ;;  %v847_v17 = vadd.f32 %v827_v21, %v826_v44  ;;  %v831_v47 = vadd.f32 %v815_v28, %v2375_v53 }
 0x12f   : > { %2569 = vst [vmem:[#allocation24_spill] sm:$0xff] %v2390_v15 }
 0x130   : > { %v825_v35 = vadd.f32 %v809_v55, %v2323_v14  ;;  %v839_v18 = vadd.f32 %v838_v8, %v824_v20  ;;  %v848_v58 = vadd.f32 %v847_v17, %v828_v10  ;;  %v816_v55 = vadd.f32 %v2371_v33, %v2379_v6 }
 0x131   : > { %v817_v8 = vadd.f32 %v2390_v15, %v2395_v11 }
 0x132   : > { %v840_v24 = vadd.f32 %v839_v18, %v825_v35  ;;  %v849_v63 = vadd.f32 %v848_v58, %v829_v57 }
 0x133   : > { %v797_v49 = vpop.f32.mrf.mxu2 }
 0x134   : > { %v2385_v12 = vadd.f32 %v2165_v32, %v797_v49  ;;  %v841_v19 = vrot.slane %v840_v24, 4  ;;  %v850_v20 = vadd.f32 %v849_v63, %v830_v37 }
 0x136   : > { %2568 = vst [vmem:[#allocation23_spill] sm:$0xff] %v2385_v12  ;;  %v832_v0 = vadd.f32 %v816_v55, %v2385_v12  ;;  %v842_v21 = vadd.f32 %v841_v19, %v840_v24  ;;  %v851_v35 = vadd.f32 %v850_v20, %v831_v47 }
 0x138   : > { %v852_v41 = vadd.f32 %v851_v35, %v832_v0  ;;  %v843_v18 = vrot.slane %v842_v21, 2  ;;  %v945_v0 = vld [vmem:[%s2532_s7] sm:$0xff] }
 0x139   : > { %957 = vst [vmem:[#allocation1] ss:$2 sm:$0xff] %v945_v0 }
 0x13a   : > { %v844_v26 = vadd.f32 %v843_v18, %v842_v21 }
 0x13b   : > { %v799_v5 = vpop.f32.mrf.mxu2 }
 0x13c   : > { %v2401_v44 = vadd.f32 %v2165_v32, %v799_v5  ;;  %v845_v17 = vrot.slane %v844_v26, 1  ;;  %v1670_v32 = vld [vmem:[%s2531_s6] ss:$0 sm:$0xff] }
 0x13e   : > { %2570 = vst [vmem:[#allocation25_spill] sm:$0xff] %v2401_v44  ;;  %v833_v62 = vadd.f32 %v817_v8, %v2401_v44  ;;  %v846_v24 = vadd.f32 %v845_v17, %v844_v26 }
 0x140   : > { %v853_v10 = vadd.f32 %v852_v41, %v833_v62  ;;  %v961_v18 = vld.sshfl [vmem:[#allocation1 + $0x8] sm:$0xff pattern:$0x75316420] }
 0x141   : > { %1517 = vmatpush.msk.msra.mxu3 %vm967_vm3, %v961_v18 }
 0x142   : > { %v854_v45 = vrot.slane %v853_v10, 4 }
 0x144   : > { %v855_v51 = vadd.f32 %v854_v45, %v853_v10  ;;  %v960_v10 = vld.sshfl [vmem:[#allocation1] sm:$0xff pattern:$0x75316420] }
 0x145   : > { %1515 = vmatpush.msk.msra.mxu0 %vm967_vm3, %v960_v10  ;;  %v1822_v10 = vmov 1.0  }
 0x146   : > { %v856_v49 = vrot.slane %v855_v51, 2 }
 0x148   : > { %v857_v57 = vadd.f32 %v856_v49, %v855_v51  ;;  %v946_v51 = vld [vmem:[%s2532_s7 + $0x8] sm:$0xf] }
 0x149   : > { %959 = vst [vmem:[#allocation1 + $0x10] ss:$2 sm:$0xff] %v946_v51 }
 0x14a   : > { %v858_v43 = vrot.slane %v857_v57, 1 }
 0x14c   : > { %v859_v58 = vadd.f32 %v858_v43, %v857_v57 }
 0x14e   : > { %v883_v28 = vsel %vm882_vm1, %v859_v58, %v846_v24 }
 0x14f   : > { %901 = vmatmul.f32.vlgmr.msrb.gmra.mxu0 %v883_v28 }
 0x1cc   : > { %v902_v37 = vpop.f32.mrf.mxu0 }
 0x1cd   : > { %v903_v55 = vadd.f32 %v1670_v32, %v902_v37  ;;  %v962_v32 = vld.sshfl [vmem:[#allocation1 + $0x10] sm:$0xff pattern:$0x75316420] }
 0x1ce   : > { %1519 = vmatpush.msk.msrb.mxu3 %vm967_vm3, %v962_v32 }
 0x1cf   : > { %v906_v63 = vmul.f32 0.70710677, %v903_v55 }
 0x1d1   : > { %v909_v19 = vand.u32 2147483647, %v906_v63  ;;  %vm907_vm7 = vcmp.lt.f32.partialorder %v906_v63, 0.0  ;;  %v1588_v63 = vld [vmem:[#allocation5 + $0x20] sm:$0xff] }
 0x1d2   : > { %v908_v18 = vsel %vm907_vm7, -1.0, %v1822_v10 }
 0x1d3   : > { %v910_v47 = vmul.f32 0.3275911, %v909_v19  ;;  %v936_v57 = vsub.f32 0.0, %v909_v19 }
 0x1d5   : > { %v911_v20 = vadd.f32 1.0, %v910_v47  ;;  %v937_v58 = vmul.f32 %v936_v57, %v909_v19  ;;  %v905_v19 = vmul.f32 0.5, %v903_v55  ;;  %v1590_v57 = vld [vmem:[#allocation5 + $0x30] sm:$0xff]  ;;  %v947_v55 = vld [vmem:[%s2533_s8] sm:$0x7] }
 0x1d7   : > { %1672 = vrcp.f32 %v911_v20  ;;  %v923_v35 = vand.u32 2147483648, %v911_v20  ;;  %v921_v62 = vand.u32 2147483647, %v911_v20  ;;  %vm917_vm4 = vweird.f32 %v911_v20 }
 0x1d8   : > { %v938_v47 = vmul.f32 1.442695, %v937_v58  ;;  %v950_v58 = vperm.slane %v947_v55, 1 }
 0x1d9   : > { %v924_v26 = vor.u32 1.1754944e-38, %v923_v35  ;;  %vm922_vm6 = vcmp.eq.f32.partialorder %v921_v62, 8.507059e+37 }
 0x1da   : > { %1674 = vpow2.f32 %v938_v47 }
 0x1dd   : > { %v1673_v5 = vpop.eup %1672 }
 0x1de   : > { %v913_v21 = vmul.f32 %v1673_v5, %v911_v20  ;;  %vm918_vm2 = vweird.f32 %v1673_v5 }
 0x1df   : > { %vm919_vm5 = vmor %vm917_vm4, %vm918_vm2 }
 0x1e0   : > { %v914_v8 = vsub.f32 1.0, %v913_v21 }
 0x1e2   : > { %v915_v41 = vmul.f32 %v1673_v5, %v914_v8 }
 0x1e4   : > { %v916_v45 = vadd.f32 %v1673_v5, %v915_v41  ;;  %v1675_v41 = vpop.eup %1674 }
 0x1e6   : > { %v920_v49 = vsel %vm919_vm5, %v1673_v5, %v916_v45 }
 0x1e7   : > { %v925_v17 = vsel %vm922_vm6, %v924_v26, %v920_v49  ;;  %v1591_v49 = vld [vmem:[#allocation5 + $0x38] sm:$0xff] }
 0x1e8   : > { %v927_v43 = vmul.f32 1.0614054, %v925_v17  ;;  %1225 = vmatpush.bf16.msrb.mxu1 %v1591_v49 }
 0x1ea   : > { %v928_v24 = vadd.f32 -1.4531521, %v927_v43 }
 0x1ec   : > { %v929_v28 = vmul.f32 %v928_v24, %v925_v17  ;;  %1226 = vmatpush.bf16.msrb.mxu1 %v1590_v57  ;;  %v1587_v24 = vld [vmem:[#allocation5 + $0x18] sm:$0xff] }
 0x1ee   : > { %v930_v37 = vadd.f32 1.4214138, %v929_v28  ;;  %v949_v28 = vperm.slane %v947_v55, 0 }
 0x1f0   : > { %v931_v20 = vmul.f32 %v930_v37, %v925_v17  ;;  %v1586_v37 = vld [vmem:[#allocation5 + $0x10] sm:$0xff] }
 0x1f2   : > { %v932_v0 = vadd.f32 -0.28449672, %v931_v20  ;;  %v951_v20 = vperm.slane %v947_v55, 2 }
 0x1f4   : > { %v933_v21 = vmul.f32 %v932_v0, %v925_v17 }
 0x1f6   : > { %v934_v8 = vadd.f32 0.2548296, %v933_v21 }
 0x1f8   : > { %v935_v35 = vmul.f32 %v934_v8, %v925_v17  ;;  %v1589_v17 = vld [vmem:[#allocation5 + $0x28] sm:$0xff] }
 0x1f9   : > { %1227 = vmatpush.bf16.msrb.mxu1 %v1589_v17  ;;  %v1585_v8 = vld [vmem:[#allocation5 + $0x8] sm:$0xff] }
 0x1fa   : > { %v940_v5 = vmul.f32 %v1675_v41, %v935_v35 }
 0x1fc   : > { %v941_v62 = vsub.f32 1.0, %v940_v5  ;;  %v1584_v5 = vld [vmem:[#allocation5] sm:$0xff] }
 0x1fd   : > { %1228 = vmatpush.bf16.msrb.mxu1 %v1588_v63 }
 0x1fe   : > { %v942_v45 = vmul.f32 %v941_v62, %v908_v18 }
 0x200   : > { %v943_v51 = vadd.f32 1.0, %v942_v45 }
 0x201   : > { %1229 = vmatpush.bf16.msrb.mxu1 %v1587_v24 }
 0x202   : > { %v944_v26 = vmul.f32 %v943_v51, %v905_v19 }
 0x204   : > { %1516 = vmatmul.msk.f32.vlgmr.msra.gmra.mxu0 %vm963_vm8, %v944_v26  ;;  %1518 = vmatmul.msk.f32.vlgmr.msra.gmra.mxu3 %vm963_vm8, %v944_v26 }
 0x205   : > { %1594 = vmatpush.bf16.msra.mxu3 %v1591_v49  ;;  %1230 = vmatpush.bf16.msrb.mxu1 %v1586_v37 }
 0x209   : > { %1595 = vmatpush.bf16.msra.mxu3 %v1590_v57  ;;  %1231 = vmatpush.bf16.msrb.mxu1 %v1585_v8 }
 0x20c   : > { %1520 = vmatmul.msk.f32.vlgmr.msrb.gmra.mxu3 %vm963_vm8, %v944_v26 }
 0x20d   : > { %1596 = vmatpush.bf16.msra.mxu3 %v1589_v17  ;;  %1232 = vmatpush.bf16.msrb.mxu1 %v1584_v5 }
 0x211   : > { %1597 = vmatpush.bf16.msra.mxu3 %v1588_v63 }
 0x215   : > { %1598 = vmatpush.bf16.msra.mxu3 %v1587_v24 }
 0x219   : > { %1599 = vmatpush.bf16.msra.mxu3 %v1586_v37 }
 0x21d   : > { %1600 = vmatpush.bf16.msra.mxu3 %v1585_v8 }
 0x221   : > { %1601 = vmatpush.bf16.msra.mxu3 %v1584_v5 }
 0x281   : > { %v991_v32 = vpop.f32.mrf.mxu0 }
 0x282   : > { %v992_v0 = vadd.f32 %v991_v32, %v949_v28 }
 0x287   : > { %v1011_v43 = vpop.f32.mrf.mxu3 }
 0x288   : > { %v1012_v47 = vadd.f32 %v1011_v43, %v950_v58 }
 0x28a   : > { %v1034_v35 = vmax.f32 %v992_v0, %v1012_v47 }
 0x28f   : > { %v1031_v21 = vpop.f32.mrf.mxu3 }
 0x290   : > { %v1032_v41 = vadd.f32 %v1031_v21, %v951_v20  ;;  %v2571_v21 = vld [vmem:[#allocation14_spill] sm:$0xff] }
 0x292   : > { %v1035_v62 = vmax.f32 %v1034_v35, %v1032_v41  ;;  %v2572_v35 = vld [vmem:[#allocation13_spill] sm:$0xff] }
 0x294   : > { %v1036_v10 = vsub.f32 %v992_v0, %v1035_v62  ;;  %v1039_v18 = vsub.f32 %v1012_v47, %v1035_v62  ;;  %v1042_v45 = vsub.f32 %v1032_v41, %v1035_v62  ;;  %v2573_v62 = vld [vmem:[#allocation16_spill] sm:$0xff] }
 0x296   : > { %v1037_v19 = vmul.f32 1.442695, %v1036_v10  ;;  %v1040_v51 = vmul.f32 1.442695, %v1039_v18  ;;  %v1043_v26 = vmul.f32 1.442695, %v1042_v45 }
 0x297   : > { %v2574_v18 = vld [vmem:[#allocation18_spill] sm:$0xff] }
 0x298   : > { %1676 = vpow2.f32 %v1037_v19  ;;  %v2575_v19 = vld [vmem:[#allocation15_spill] sm:$0xff] }
 0x299   : > { %1678 = vpow2.f32 %v1040_v51 }
 0x29a   : > { %1680 = vpow2.f32 %v1043_v26 }
 0x29e   : > { %v1677_v49 = vpop.eup %1676 }
 0x29f   : > { %v1679_v57 = vpop.eup %1678 }
 0x2a0   : > { %v1045_v17 = vadd.f32 %v1679_v57, %v1677_v49  ;;  %v1681_v63 = vpop.eup %1680 }
 0x2a2   : > { %v1046_v55 = vadd.f32 %v1681_v63, %v1045_v17 }
 0x2a4   : > { %1682 = vrcp.f32 %v1046_v55 }
 0x2aa   : > { %v1683_v43 = vpop.eup %1682 }
 0x2ab   : > { %v1048_v24 = vmul.f32 %v1683_v43, %v1677_v49  ;;  %v1051_v58 = vmul.f32 %v1683_v43, %v1679_v57  ;;  %v1054_v28 = vmul.f32 %v1683_v43, %v1681_v63  ;;  %v2576_v57 = vld [vmem:[#allocation19_spill] sm:$0xff]  ;;  %v2577_v63 = vld [vmem:[#allocation17_spill] sm:$0xff] }
 0x2ad   : > { %v1057_v32 = vperm.slane %v1048_v24, 0  ;;  %v1077_v37 = vperm.slane %v1051_v58, 0  ;;  %v1113_v47 = vperm.slane %v1054_v28, 0 }
 0x2af   : > { %v1061_v20 = vmul.f32 %v1057_v32, %v2170_v40  ;;  %v1062_v0 = vmul.f32 %v1057_v32, %v2152_v22  ;;  %v1081_v8 = vmul.f32 %v1077_v37, %v2571_v21  ;;  %v1082_v41 = vmul.f32 %v1077_v37, %v2572_v35  ;;  %v2578_v22 = vld [vmem:[#allocation22_spill] sm:$0xff] }
 0x2b0   : > { %v1117_v5 = vmul.f32 %v1113_v47, %v2206_v34  ;;  %v1063_v10 = vmul.f32 %v1057_v32, %v2573_v62  ;;  %v1064_v45 = vmul.f32 %v1057_v32, %v2574_v18  ;;  %v1083_v51 = vmul.f32 %v1077_v37, %v2575_v19 }
 0x2b1   : > { %v1097_v26 = vadd.f32 %v1081_v8, %v1061_v20  ;;  %v1098_v49 = vadd.f32 %v1082_v41, %v1062_v0  ;;  %v1118_v17 = vmul.f32 %v1113_v47, %v2576_v57  ;;  %v1084_v40 = vmul.f32 %v1077_v37, %v2577_v63  ;;  %v2579_v20 = vld [vmem:[#allocation21_spill] sm:$0xff]  ;;  %v2580_v41 = vld [vmem:[#allocation20_spill] sm:$0xff] }
 0x2b2   : > { %v1099_v55 = vadd.f32 %v1083_v51, %v1063_v10  ;;  %v1119_v43 = vmul.f32 %v1113_v47, %v2578_v22  ;;  %v1120_v34 = vmul.f32 %v1113_v47, %v2234_v27  ;;  %v1065_v0 = vmul.f32 %v1057_v32, %v2579_v20 }
 0x2b3   : > { %v1133_v21 = vadd.f32 %v1117_v5, %v1097_v26  ;;  %v1134_v44 = vadd.f32 %v1118_v17, %v1098_v49  ;;  %v1100_v35 = vadd.f32 %v1084_v40, %v1064_v45  ;;  %v1066_v8 = vmul.f32 %v1057_v32, %v2230_v38 }
 0x2b4   : > { %v1135_v12 = vadd.f32 %v1119_v43, %v1099_v55  ;;  %v1085_v19 = vmul.f32 %v1077_v37, %v2580_v41  ;;  %v1086_v10 = vmul.f32 %v1077_v37, %v2226_v29  ;;  %v1121_v45 = vmul.f32 %v1113_v47, %v2259_v61 }
 0x2b5   : > { %v1149_v62 = vpack.c.bf16 %v1134_v44, %v1133_v21  ;;  %v1136_v15 = vadd.f32 %v1120_v34, %v1100_v35  ;;  %v1122_v27 = vmul.f32 %v1113_v47, %v2279_v4  ;;  %v1087_v38 = vmul.f32 %v1077_v37, %v2245_v30 }
 0x2b6   : > { %v1101_v51 = vadd.f32 %v1085_v19, %v1065_v0  ;;  %v1102_v5 = vadd.f32 %v1086_v10, %v1066_v8  ;;  %v1088_v57 = vmul.f32 %v1077_v37, %v2265_v2  ;;  %v1123_v63 = vmul.f32 %v1113_v47, %v2294_v59 }
 0x2b7   : > { %1233 = vmatmul.bf16.vlgmr.msrb.gmra.mxu1 %v1149_v62  ;;  %v1150_v18 = vpack.c.bf16 %v1136_v15, %v1135_v12  ;;  %v1067_v12 = vmul.f32 %v1057_v32, %v2255_v54  ;;  %v1068_v15 = vmul.f32 %v1057_v32, %v2272_v46  ;;  %v1124_v61 = vmul.f32 %v1113_v47, %v2323_v14 }
 0x2b8   : > { %v1137_v26 = vadd.f32 %v1121_v45, %v1101_v51  ;;  %v1138_v44 = vadd.f32 %v1122_v27, %v1102_v5  ;;  %v1050_v40 = vrot.slane %v1048_v24, 1  ;;  %v1053_v4 = vrot.slane %v1051_v58, 1  ;;  %v2581_v45 = vld [vmem:[#allocation24_spill] sm:$0xff] }
 0x2b9   : > { %1238 = vmatmul.bf16.vlgmr.msra.gmra.mxu3 %v1150_v18  ;;  %v1103_v17 = vadd.f32 %v1087_v38, %v1067_v12  ;;  %v1104_v29 = vadd.f32 %v1088_v57, %v1068_v15  ;;  %v1056_v54 = vrot.slane %v1054_v28, 1 }
 0x2ba   : > { %v1151_v49 = vpack.c.bf16 %v1138_v44, %v1137_v26  ;;  %v1058_v43 = vperm.slane %v1050_v40, 0  ;;  %v1078_v21 = vperm.slane %v1053_v4, 0  ;;  %v2582_v44 = vld [vmem:[#allocation23_spill] sm:$0xff] }
 0x2bb   : > { %v1139_v55 = vadd.f32 %v1123_v63, %v1103_v17  ;;  %v1140_v22 = vadd.f32 %v1124_v61, %v1104_v29  ;;  %v1114_v59 = vperm.slane %v1056_v54, 0 }
 0x2bc   : > { %v1069_v46 = vmul.f32 %v1058_v43, %v2268_v7  ;;  %v1070_v30 = vmul.f32 %v1058_v43, %v2286_v25  ;;  %v1089_v2 = vmul.f32 %v1078_v21, %v2290_v50  ;;  %v1090_v32 = vmul.f32 %v1078_v21, %v2275_v48 }
 0x2bd   : > { %v1152_v35 = vpack.c.bf16 %v1140_v22, %v1139_v55  ;;  %v1125_v24 = vmul.f32 %v1114_v59, %v2315_v13  ;;  %v1126_v58 = vmul.f32 %v1114_v59, %v2302_v9  ;;  %v1071_v28 = vmul.f32 %v1058_v43, %v2309_v56 }
 0x2be   : > { %v1105_v37 = vadd.f32 %v1089_v2, %v1069_v46  ;;  %v1106_v14 = vadd.f32 %v1090_v32, %v1070_v30  ;;  %v1072_v7 = vmul.f32 %v1058_v43, %v2332_v1  ;;  %v1091_v25 = vmul.f32 %v1078_v21, %v2298_v52 }
 0x2bf   : > { %v1092_v50 = vmul.f32 %v1078_v21, %v2319_v3  ;;  %v1127_v20 = vmul.f32 %v1114_v59, %v2327_v31  ;;  %v1128_v13 = vmul.f32 %v1114_v59, %v2345_v42  ;;  %v1073_v41 = vmul.f32 %v1058_v43, %v2350_v23 }
 0x2c0   : > { %v1141_v47 = vadd.f32 %v1125_v24, %v1105_v37  ;;  %v1142_v34 = vadd.f32 %v1126_v58, %v1106_v14  ;;  %v1107_v48 = vadd.f32 %v1091_v25, %v1071_v28  ;;  %v1074_v56 = vmul.f32 %v1058_v43, %v2366_v39 }
 0x2c1   : > { %v1108_v18 = vadd.f32 %v1092_v50, %v1072_v7  ;;  %v1093_v1 = vmul.f32 %v1078_v21, %v2340_v60  ;;  %v1094_v52 = vmul.f32 %v1078_v21, %v2358_v36  ;;  %v1129_v10 = vmul.f32 %v1114_v59, %v2362_v16 }
 0x2c2   : > { %v1153_v62 = vpack.c.bf16 %v1142_v34, %v1141_v47  ;;  %v1143_v0 = vadd.f32 %v1127_v20, %v1107_v48  ;;  %v1130_v31 = vmul.f32 %v1114_v59, %v2375_v53  ;;  %v1075_v23 = vmul.f32 %v1058_v43, %v2379_v6  ;;  %v1671_v6 = vld [vmem:[%s2535_s10] ss:$0 sm:$0xff] }
 0x2c3   : > { %v1144_v9 = vadd.f32 %v1128_v13, %v1108_v18  ;;  %v1109_v19 = vadd.f32 %v1093_v1, %v1073_v41  ;;  %v1110_v3 = vadd.f32 %v1094_v52, %v1074_v56  ;;  %v1076_v39 = vmul.f32 %v1058_v43, %v2395_v11 }
 0x2c4   : > { %v1095_v60 = vmul.f32 %v1078_v21, %v2371_v33  ;;  %v1096_v36 = vmul.f32 %v1078_v21, %v2581_v45  ;;  %v1131_v16 = vmul.f32 %v1114_v59, %v2582_v44 }
 0x2c5   : > { %v1154_v8 = vpack.c.bf16 %v1144_v9, %v1143_v0  ;;  %v1145_v51 = vadd.f32 %v1129_v10, %v1109_v19  ;;  %v1146_v42 = vadd.f32 %v1130_v31, %v1110_v3 }
 0x2c6   : > { %v1111_v27 = vadd.f32 %v1095_v60, %v1075_v23  ;;  %v1112_v26 = vadd.f32 %v1096_v36, %v1076_v39 }
 0x2c7   : > { %v1155_v5 = vpack.c.bf16 %v1146_v42, %v1145_v51 }
 0x2c8   : > { %v1147_v12 = vadd.f32 %v1131_v16, %v1111_v27 }
 0x2c9   : > { %1243 = vmatmul.bf16.gmra.mxu3 %v1151_v49  ;;  %v2583_v49 = vld [vmem:[#allocation25_spill] sm:$0xff] }
 0x2ca   : > { %v1132_v53 = vmul.f32 %v1114_v59, %v2583_v49 }
 0x2cc   : > { %v1148_v15 = vadd.f32 %v1132_v53, %v1112_v26 }
 0x2ce   : > { %v1156_v38 = vpack.c.bf16 %v1148_v15, %v1147_v12 }
 0x2d9   : > { %1248 = vmatmul.bf16.gmra.mxu3 %v1152_v35 }
 0x2e9   : > { %1253 = vmatmul.bf16.gmra.mxu3 %v1153_v62 }
 0x2f9   : > { %1258 = vmatmul.bf16.gmra.mxu3 %v1154_v8 }
 0x309   : > { %1263 = vmatmul.bf16.gmra.mxu3 %v1155_v5 }
 0x319   : > { %1268 = vmatmul.bf16.gmra.mxu3 %v1156_v38 }
 0x334   : > { %v1234_v33 = vpop.f32.mrf.mxu1 }
 0x335   : > { %v1235_v11 = vadd.f32 %v1671_v6, %v1234_v33 }
 0x337   : > { %1274 = vst [vmem:[%s2473_s14] sm:$0xff] %v1235_v11 }
 0x33c   : > { %v1239_v57 = vpop.f32.mrf.mxu3  ;;  %v1236_v17 = vpop.f32.mrf.mxu1 }
 0x33d   : > { %v1240_v29 = vadd.f32 %v1671_v6, %v1239_v57  ;;  %v1237_v63 = vadd.f32 %v1671_v6, %v1236_v17 }
 0x33f   : > { %1276 = vst [vmem:[%s2473_s14 + $0x10] sm:$0xff] %v1240_v29 }
 0x340   : > { %1275 = vst [vmem:[%s2473_s14 + $0x8] sm:$0xff] %v1237_v63 }
 0x344   : > { %v1241_v61 = vpop.f32.mrf.mxu3 }
 0x345   : > { %v1242_v40 = vadd.f32 %v1671_v6, %v1241_v61 }
 0x347   : > { %1277 = vst [vmem:[%s2473_s14 + $0x18] sm:$0xff] %v1242_v40 }
 0x34c   : > { %v1244_v4 = vpop.f32.mrf.mxu3 }
 0x34d   : > { %v1245_v55 = vadd.f32 %v1671_v6, %v1244_v4 }
 0x34f   : > { %1278 = vst [vmem:[%s2473_s14 + $0x20] sm:$0xff] %v1245_v55 }
 0x354   : > { %v1246_v22 = vpop.f32.mrf.mxu3 }
 0x355   : > { %v1247_v43 = vadd.f32 %v1671_v6, %v1246_v22 }
 0x357   : > { %1279 = vst [vmem:[%s2473_s14 + $0x28] sm:$0xff] %v1247_v43 }
 0x35c   : > { %v1249_v21 = vpop.f32.mrf.mxu3 }
 0x35d   : > { %v1250_v35 = vadd.f32 %v1671_v6, %v1249_v21 }
 0x35f   : > { %1280 = vst [vmem:[%s2473_s14 + $0x30] sm:$0xff] %v1250_v35 }
 0x364   : > { %v1251_v54 = vpop.f32.mrf.mxu3 }
 0x365   : > { %v1252_v46 = vadd.f32 %v1671_v6, %v1251_v54 }
 0x367   : > { %1281 = vst [vmem:[%s2473_s14 + $0x38] sm:$0xff] %v1252_v46 }
 0x36c   : > { %v1254_v30 = vpop.f32.mrf.mxu3 }
 0x36d   : > { %v1255_v2 = vadd.f32 %v1671_v6, %v1254_v30 }
 0x36f   : > { %1282 = vst [vmem:[%s2473_s14 + $0x40] sm:$0xff] %v1255_v2 }
 0x374   : > { %v1256_v32 = vpop.f32.mrf.mxu3 }
 0x375   : > { %v1257_v59 = vadd.f32 %v1671_v6, %v1256_v32 }
 0x377   : > { %1283 = vst [vmem:[%s2473_s14 + $0x48] sm:$0xff] %v1257_v59 }
 0x37c   : > { %v1259_v37 = vpop.f32.mrf.mxu3 }
 0x37d   : > { %v1260_v14 = vadd.f32 %v1671_v6, %v1259_v37 }
 0x37f   : > { %1284 = vst [vmem:[%s2473_s14 + $0x50] sm:$0xff] %v1260_v14 }
 0x384   : > { %v1261_v24 = vpop.f32.mrf.mxu3 }
 0x385   : > { %v1262_v58 = vadd.f32 %v1671_v6, %v1261_v24 }
 0x387   : > { %1285 = vst [vmem:[%s2473_s14 + $0x58] sm:$0xff] %v1262_v58 }
 0x38c   : > { %v1264_v47 = vpop.f32.mrf.mxu3 }
 0x38d   : > { %v1265_v34 = vadd.f32 %v1671_v6, %v1264_v47 }
 0x38f   : > { %1286 = vst [vmem:[%s2473_s14 + $0x60] sm:$0xff] %v1265_v34 }
 0x394   : > { %v1266_v62 = vpop.f32.mrf.mxu3 }
 0x395   : > { %v1267_v28 = vadd.f32 %v1671_v6, %v1266_v62 }
 0x397   : > { %1287 = vst [vmem:[%s2473_s14 + $0x68] sm:$0xff] %v1267_v28 }
 0x39c   : > { %v1269_v7 = vpop.f32.mrf.mxu3 }
 0x39d   : > { %v1270_v25 = vadd.f32 %v1671_v6, %v1269_v7 }
 0x39f   : > { %1288 = vst [vmem:[%s2473_s14 + $0x70] sm:$0xff] %v1270_v25 }
 0x3a4   : > { %v1271_v50 = vpop.f32.mrf.mxu3 }
 0x3a5   : > { %v1272_v48 = vadd.f32 %v1671_v6, %v1271_v50 }
 0x3a7   : > { %1289 = vst [vmem:[%s2473_s14 + $0x78] sm:$0xff] %v1272_v48 }
 0x3a8   : > { %1771 = shalt.err (!%p1768_p8)
}
 0x3a9   : > { %s1823_s2 = smov 128   ;;  %s1824_s14 = smov 8  }
 0x3aa   : > { %1610 = dma.vmem_to_hbm [thread:$0]  (%p1923_p5), %s1305_s25, 2048, %s1307_s30, %s1291_s12, %s1823_s2, %s1823_s2, %s1824_s14  }
 0x3ab PF: > { %p1627_p9 = scmp.ge.s32.totalorder %s1814_s20, 2  ;;  %s1321_s22 = sand.u32 1, %s1802_s17  }
 0x3ac   : > { %s1322_s24 = scalar_lea.sflag [#allocation4], %s1321_s22 }
 0x3ad   : > { %p1620_p10 = pnand %p1627_p9, %p1927_p6 }
 0x3af   : > { %p1621_p11 = pneg %p1620_p10 }
 0x3b1   : > { %1797 = dma.done.wait (%p1621_p11), %s1322_s24, 2048  }
 0x3b2   : > { %1799 = vsyncadd (%p1621_p11), %s1322_s24, 4294965248  ;;  %s2584_s19 = sld [smem:[#allocation11_spill]]  ;;  %p23_p12 = scmp.ge.s32.totalorder %s1910_s23, 4  }
 0x3b3   : > { %s2585_s26 = sld [smem:[#allocation12_spill]]  ;;  %s2586_s17 = smov %s1806_s18 }
 0x3b4   : > { %s2589_s20 = smov %s1910_s23 }
 0x3b5   :  { %25 = sbr.rel (!%p23_p12) target bundleno = 7 (0x7), region = 109 }
 0x3b8   : > { %s2587_s18 = smov %s2584_s19 }
 0x3b9   : > { %s2588_s19 = smov %s2585_s26 }
 0x3ba   :  { %1328 = vsyncpa [#allocation3], 1 }
 0x3bb   :  { %1330 = vsyncpa [#allocation3 + $0x1], 1 }
 0x3bc   :  { %1331 = vsyncpa [#allocation6], 1 }
 0x3bd   :  { %1332 = vsyncpa [#allocation4], 1 }
 0x3be   :  { %1334 = vsyncpa [#allocation4 + $0x1], 1 }

</bundles_post_ra>
